<compile_context>
chip_gen: v7x
topology: tpu7x:2x2x1
jax: 0.10.0
libtpu: 0.0.40
codegen_flags: <defaults>
</compile_context>

<pallas_src>
import math

import jax
import jax.numpy as jnp
from jax import lax
from jax.experimental import pallas as pl
from jax.experimental.pallas import tpu as pltpu

_TARGET_TILE_BYTES = 2 * 1024 * 1024   # ~2 MiB per input block per grid step


def _cdiv(a, b):
    return -(-a // b)


def _round_down(x, m):
    return (x // m) * m


def _make_iou_sums_kernel(n, tn, kps, need_mask):
    """Kernel producing per-row partial sums of p*t and p+t.

    Grid: (batch_tiles, n_splits, k_tiles_per_split); axis 2 is the reduction.
    """

    def kernel(p_ref, t_ref, iand_ref, isum_ref, iand_acc, isum_acc):
        kk = pl.program_id(2)

        @pl.when(kk == 0)
        def _():
            iand_acc[...] = jnp.zeros_like(iand_acc)
            isum_acc[...] = jnp.zeros_like(isum_acc)

        p = p_ref[...].astype(jnp.float32)
        t = t_ref[...].astype(jnp.float32)

        if need_mask:
            # Only ragged (or redundant, clamped) tiles have rem < tn.  Lanes
            # >= rem hold unspecified memory (Pallas does not bounds-check
            # partial-block reads) and must not reach the sums.  Cheap: the
            # VPU has ~5x slack vs. the DMA.
            s = pl.program_id(1)
            rem = n - (s * kps + kk) * tn          # valid lanes in this tile
            col = lax.broadcasted_iota(jnp.int32, (1, tn), 1)
            valid = col < rem
            p = jnp.where(valid, p, 0.0)
            t = jnp.where(valid, t, 0.0)

        # Two XLU reductions per tile; p + t rides a spare VPU slot.
        iand_acc[...] += jnp.sum(p * t, axis=-1, keepdims=True)
        isum_acc[...] += jnp.sum(p + t, axis=-1, keepdims=True)

        @pl.when(kk == pl.num_programs(2) - 1)
        def _():
            iand_ref[...] = iand_acc[...]
            isum_ref[...] = isum_acc[...]

    return kernel


def iou_loss(pred, target):
    """Pallas implementation of the IOU module's forward pass."""
    assert pred.shape == target.shape
    b = pred.shape[0]
    n = math.prod(pred.shape[1:])

    itemsize = jnp.dtype(pred.dtype).itemsize
    sub = max(8, 32 // itemsize)            # sublane fill: f32->8, bf16->16, int8->32

    # Reduction tile: full row if it fits the ~2 MiB budget at TB=sub,
    # otherwise a lane-aligned 64K-element-class tile (ragged tail masked).
    tn_max = _round_down(_TARGET_TILE_BYTES // (sub * itemsize), 128)
    tn = n if n <= tn_max else tn_max
    total_k = _cdiv(n, tn)

    # Batch tile: ~2 MiB per input block, dtype-aware sublane multiple.
    if b < sub:
        tb = b                               # block dim == full array dim (allowed)
    else:
        tb = (_TARGET_TILE_BYTES // (tn * itemsize)) // sub * sub
        tb = max(sub, min(tb, _round_down(b, sub)))
    grid_b = _cdiv(b, tb)

    # v7x: keep both TensorCores busy when the batch grid collapses to one
    # step by splitting the reduction dim into 2 "parallel" halves.
    n_splits = 2 if (grid_b == 1 and total_k >= 2) else 1
    kps = _cdiv(total_k, n_splits)           # k tiles per split
    need_mask = (n_splits * kps * tn != n)   # ragged tail and/or redundant tile

    if n_splits * kps > total_k:
        # Odd tile count: clamp the one redundant block in-bounds; the kernel
        # mask (rem <= 0 there) zeroes its contribution.
        def col_block(s, kk):
            return jnp.minimum(s * kps + kk, total_k - 1)
    else:
        def col_block(s, kk):
            return s * kps + kk

    p2 = pred.reshape(b, n)
    t2 = target.reshape(b, n)

    in_specs = [
        pl.BlockSpec((tb, tn), lambda i, s, kk: (i, col_block(s, kk))),
        pl.BlockSpec((tb, tn), lambda i, s, kk: (i, col_block(s, kk))),
    ]
    out_spec = pl.BlockSpec((None, tb, 1), lambda i, s, kk: (s, i, 0))

    iand_parts, isum_parts = pl.pallas_call(
        _make_iou_sums_kernel(n, tn, kps, need_mask),
        out_shape=(
            jax.ShapeDtypeStruct((n_splits, b, 1), jnp.float32),
            jax.ShapeDtypeStruct((n_splits, b, 1), jnp.float32),
        ),
        grid_spec=pltpu.PrefetchScalarGridSpec(
            num_scalar_prefetch=0,
            grid=(grid_b, n_splits, kps),
            in_specs=in_specs,
            out_specs=[out_spec, out_spec],
            scratch_shapes=[
                pltpu.VMEM((tb, 1), jnp.float32),
                pltpu.VMEM((tb, 1), jnp.float32),
            ],
        ),
        compiler_params=pltpu.CompilerParams(
            dimension_semantics=("parallel", "parallel", "arbitrary"),
        ),
    )(p2, t2)

    # Tiny epilogue over (n_splits, b): combine halves, apply the torch
    # `if Ior: Iand/Ior else 1` rule, and average over the true batch size.
    iand = jnp.sum(iand_parts[:, :, 0], axis=0)
    ior = jnp.sum(isum_parts[:, :, 0], axis=0) - iand
    iou = jnp.where(ior != 0.0, iand / jnp.where(ior != 0.0, ior, 1.0), 1.0)
    return jnp.sum(1.0 - iou) / b


def _iou_reference(pred, target):
    # Pure-JAX reference mirroring the torch loop.
    b = pred.shape[0]
    total = 0.0
    for i in range(b):
        iand = jnp.sum(target[i] * pred[i])
        ior = jnp.sum(target[i]) + jnp.sum(pred[i]) - iand
        iou = jnp.where(ior != 0.0, iand / jnp.where(ior != 0.0, ior, 1.0), 1.0)
        total = total + (1.0 - iou)
    return total / b


if __name__ == "__main__":
    key = jax.random.PRNGKey(0)
    kp, kt = jax.random.split(key)
    B, C, H, W = 2, 4, 16, 16
    # Sigmoid-like values in [0, 1] as typical saliency preds / binary masks.
    pred = jax.nn.sigmoid(jax.random.normal(kp, (B, C, H, W), dtype=jnp.float32))
    target = (jax.random.uniform(kt, (B, C, H, W)) > 0.5).astype(jnp.float32)

    loss = jax.block_until_ready(iou_loss(pred, target))
    ref = jax.block_until_ready(_iou_reference(pred, target))
    assert jnp.allclose(loss, ref, rtol=1e-5, atol=1e-5), (loss, ref)
    print("KERNEL_OK")
</pallas_src>

<mosaic_0001>
module attributes {stable_mosaic.version = 11 : i64} {
  func.func @kernel(%arg0: i32, %arg1: i32, %arg2: i32, %arg3: memref<2x1024xf32, #tpu.memory_space<vmem>>, %arg4: memref<2x1024xf32, #tpu.memory_space<vmem>>, %arg5: memref<1x2x1xf32, #tpu.memory_space<vmem>>, %arg6: memref<1x2x1xf32, #tpu.memory_space<vmem>>, %arg7: memref<2x1xf32, #tpu.memory_space<vmem>>, %arg8: memref<2x1xf32, #tpu.memory_space<vmem>>) attributes {dimension_semantics = [#tpu.dimension_semantics<parallel>, #tpu.dimension_semantics<parallel>, #tpu.dimension_semantics<arbitrary>], iteration_bounds = array<i64: 1, 1, 1>, scalar_prefetch = 0 : i64, scratch_operands = 2 : i64, tpu.core_type = #tpu.core_type<tc>, window_params = [{transform_indices = @transform_0, window_bounds = array<i64: 2, 1024>}, {transform_indices = @transform_1, window_bounds = array<i64: 2, 1024>}, {transform_indices = @transform_2, window_bounds = array<i64: 1, 2, 1>}, {transform_indices = @transform_3, window_bounds = array<i64: 1, 2, 1>}]} {
    %c0_i32 = arith.constant 0 : i32
    %0 = arith.cmpi eq, %arg2, %c0_i32 : i32
    %1 = arith.extui %0 : i1 to i32
    %c0_i32_0 = arith.constant 0 : i32
    %2 = arith.cmpi ne, %1, %c0_i32_0 : i32
    scf.if %2 {
      %cst_15 = arith.constant 0.000000e+00 : f32
      %20 = vector.broadcast %cst_15 : f32 to vector<2x1xf32>
      %c0_16 = arith.constant 0 : index
      %c0_17 = arith.constant 0 : index
      %21 = vector.load %arg7[%c0_16, %c0_17] : memref<2x1xf32, #tpu.memory_space<vmem>>, vector<2x1xf32>
      tpu.vector_store %arg7[%c0_16, %c0_17], %20 {strides = array<i32>} : memref<2x1xf32, #tpu.memory_space<vmem>>, vector<2x1xf32>,
      %cst_18 = arith.constant 0.000000e+00 : f32
      %22 = vector.broadcast %cst_18 : f32 to vector<2x1xf32>
      %c0_19 = arith.constant 0 : index
      %c0_20 = arith.constant 0 : index
      %23 = vector.load %arg8[%c0_19, %c0_20] : memref<2x1xf32, #tpu.memory_space<vmem>>, vector<2x1xf32>
      tpu.vector_store %arg8[%c0_19, %c0_20], %22 {strides = array<i32>} : memref<2x1xf32, #tpu.memory_space<vmem>>, vector<2x1xf32>,
    } else {
    }
    %c0 = arith.constant 0 : index
    %c0_1 = arith.constant 0 : index
    %3 = vector.load %arg3[%c0, %c0_1] : memref<2x1024xf32, #tpu.memory_space<vmem>>, vector<2x1024xf32>
    %c0_2 = arith.constant 0 : index
    %c0_3 = arith.constant 0 : index
    %4 = vector.load %arg4[%c0_2, %c0_3] : memref<2x1024xf32, #tpu.memory_space<vmem>>, vector<2x1024xf32>
    %c0_4 = arith.constant 0 : index
    %c0_5 = arith.constant 0 : index
    %5 = vector.load %arg7[%c0_4, %c0_5] : memref<2x1xf32, #tpu.memory_space<vmem>>, vector<2x1xf32>
    %6 = arith.mulf %3, %4 : vector<2x1024xf32>
    %cst = arith.constant dense<0.000000e+00> : vector<2xf32>
    %7 = vector.multi_reduction <add>, %6, %cst [1] : vector<2x1024xf32> to vector<2xf32>
    %8 = vector.shape_cast %7 : vector<2xf32> to vector<2x1xf32>
    %9 = arith.addf %5, %8 : vector<2x1xf32>
    %c0_6 = arith.constant 0 : index
    %c0_7 = arith.constant 0 : index
    %10 = vector.load %arg7[%c0_6, %c0_7] : memref<2x1xf32, #tpu.memory_space<vmem>>, vector<2x1xf32>
    tpu.vector_store %arg7[%c0_6, %c0_7], %9 {strides = array<i32>} : memref<2x1xf32, #tpu.memory_space<vmem>>, vector<2x1xf32>,
    %c0_8 = arith.constant 0 : index
    %c0_9 = arith.constant 0 : index
    %11 = vector.load %arg8[%c0_8, %c0_9] : memref<2x1xf32, #tpu.memory_space<vmem>>, vector<2x1xf32>
    %12 = arith.addf %3, %4 : vector<2x1024xf32>
    %cst_10 = arith.constant dense<0.000000e+00> : vector<2xf32>
    %13 = vector.multi_reduction <add>, %12, %cst_10 [1] : vector<2x1024xf32> to vector<2xf32>
    %14 = vector.shape_cast %13 : vector<2xf32> to vector<2x1xf32>
    %15 = arith.addf %11, %14 : vector<2x1xf32>
    %c0_11 = arith.constant 0 : index
    %c0_12 = arith.constant 0 : index
    %16 = vector.load %arg8[%c0_11, %c0_12] : memref<2x1xf32, #tpu.memory_space<vmem>>, vector<2x1xf32>
    tpu.vector_store %arg8[%c0_11, %c0_12], %15 {strides = array<i32>} : memref<2x1xf32, #tpu.memory_space<vmem>>, vector<2x1xf32>,
    %c0_i32_13 = arith.constant 0 : i32
    %17 = arith.cmpi eq, %arg2, %c0_i32_13 : i32
    %18 = arith.extui %17 : i1 to i32
    %c0_i32_14 = arith.constant 0 : i32
    %19 = arith.cmpi ne, %18, %c0_i32_14 : i32
    scf.if %19 {
      %c0_15 = arith.constant 0 : index
      %c0_16 = arith.constant 0 : index
      %20 = vector.load %arg7[%c0_15, %c0_16] : memref<2x1xf32, #tpu.memory_space<vmem>>, vector<2x1xf32>
      %c0_17 = arith.constant 0 : index
      %c0_18 = arith.constant 0 : index
      %c0_19 = arith.constant 0 : index
      %21 = vector.load %arg5[%c0_17, %c0_18, %c0_19] : memref<1x2x1xf32, #tpu.memory_space<vmem>>, vector<1x2x1xf32>
      %22 = vector.shape_cast %21 : vector<1x2x1xf32> to vector<2x1xf32>
      %23 = vector.shape_cast %20 : vector<2x1xf32> to vector<1x2x1xf32>
      tpu.vector_store %arg5[%c0_17, %c0_18, %c0_19], %23 {strides = array<i32>} : memref<1x2x1xf32, #tpu.memory_space<vmem>>, vector<1x2x1xf32>,
      %c0_20 = arith.constant 0 : index
      %c0_21 = arith.constant 0 : index
      %24 = vector.load %arg8[%c0_20, %c0_21] : memref<2x1xf32, #tpu.memory_space<vmem>>, vector<2x1xf32>
      %c0_22 = arith.constant 0 : index
      %c0_23 = arith.constant 0 : index
      %c0_24 = arith.constant 0 : index
      %25 = vector.load %arg6[%c0_22, %c0_23, %c0_24] : memref<1x2x1xf32, #tpu.memory_space<vmem>>, vector<1x2x1xf32>
      %26 = vector.shape_cast %25 : vector<1x2x1xf32> to vector<2x1xf32>
      %27 = vector.shape_cast %24 : vector<2x1xf32> to vector<1x2x1xf32>
      tpu.vector_store %arg6[%c0_22, %c0_23, %c0_24], %27 {strides = array<i32>} : memref<1x2x1xf32, #tpu.memory_space<vmem>>, vector<1x2x1xf32>,
    } else {
    }
    return
  }
  func.func @transform_0(%arg0: i32, %arg1: i32, %arg2: i32) -> (i32, i32) {
    %c1_i32 = arith.constant 1 : i32
    %0 = arith.muli %arg1, %c1_i32 : i32
    %1 = arith.addi %0, %arg2 : i32
    %c0_i32 = arith.constant 0 : i32
    return %arg0, %1 : i32, i32
  }
  func.func @transform_1(%arg0: i32, %arg1: i32, %arg2: i32) -> (i32, i32) {
    %c1_i32 = arith.constant 1 : i32
    %0 = arith.muli %arg1, %c1_i32 : i32
    %1 = arith.addi %0, %arg2 : i32
    %c0_i32 = arith.constant 0 : i32
    return %arg0, %1 : i32, i32
  }
  func.func @transform_2(%arg0: i32, %arg1: i32, %arg2: i32) -> (i32, i32, i32) {
    %c0_i32 = arith.constant 0 : i32
    %c0_i32_0 = arith.constant 0 : i32
    return %arg1, %arg0, %c0_i32 : i32, i32, i32
  }
  func.func @transform_3(%arg0: i32, %arg1: i32, %arg2: i32) -> (i32, i32, i32) {
    %c0_i32 = arith.constant 0 : i32
    %c0_i32_0 = arith.constant 0 : i32
    return %arg1, %arg0, %c0_i32 : i32, i32, i32
  }
}

</mosaic_0001>

<bundles_post_ra>
// kernel: tpu_custom_call.1
= control target key start
LH: loop header
LB: loop body
LE: loop exit
PB: predicated region body
PF: predicated region fallthrough
CT: control target
= control target key end

     0   :  { %9 = vsyncpa [#allocation5], 0  ;;  %s339_s0 = inlined_call_operand.hbm [shape: f32[2,1024], index: 0, kind: input, shape index: {}]   ;;  %s340_s1 = inlined_call_operand.hbm [shape: f32[2,1024], index: 1, kind: input, shape index: {}]   ;;  %s341_s2 = inlined_call_operand.vmem [shape: f32[1,2,1], index: 2, kind: output, shape index: {0}]   ;;  %s342_s3 = inlined_call_operand.vmem [shape: f32[1,2,1], index: 3, kind: output, shape index: {1}]  }
   0x1   :  { %10 = vsyncpa [#allocation7], 0  ;;  %s263_s12 = smov [#allocation4]   ;;  %s264_s14 = smov [#allocation6]  }
   0x2   :  { %s21_s13 = sshll.u32 %s263_s12, 4  ;;  %s35_s15 = sshll.u32 %s264_s14, 4  ;;  %s22_s13 = int_to_ptr.vmem [resolvable:$true] %s21_s13  ;;  %s36_s15 = int_to_ptr.vmem [resolvable:$true] %s35_s15 }
   0x3   :  { %s215_s18 = scalar_lea.hbm %s339_s0, 256 }
   0x4   :  { %p216_p0 = scmp.ne.s32.totalorder %s339_s0, %s215_s18  ;;  %p219_p1 = scmp.lt.u32.totalorder %s215_s18, %s339_s0 }
   0x6   :  { %p221_p2 = pnand %p219_p1, %p216_p0 }
   0x8   :  { %224 = shalt.err (!%p221_p2)
}
   0x9   :  { %s225_s23 = scalar_lea.vmem %s22_s13, 256  ;;  %p230_p4 = scmp.lt.s32.totalorder %s22_s13, %s22_s13 }
   0xa   :  { %p226_p3 = scmp.ne.s32.totalorder %s22_s13, %s225_s23  ;;  %p231_p5 = scmp.lt.s32.totalorder %s225_s23, %s225_s23 }
   0xc   :  { %p232_p6 = por %p231_p5, %p230_p4 }
   0xe   :  { %p233_p7 = pnand %p232_p6, %p226_p3 }
  0x10   :  { %236 = shalt.err (!%p233_p7)
}
  0x11   :  { %24 = dma.hbm_to_vmem [thread:$0]  %s339_s0, 256, %s22_s13, [#allocation5]  }
  0x12   :  { %s237_s28 = scalar_lea.hbm %s340_s1, 256 }
  0x13   :  { %p238_p8 = scmp.ne.s32.totalorder %s340_s1, %s237_s28  ;;  %p241_p9 = scmp.lt.u32.totalorder %s237_s28, %s340_s1 }
  0x15   :  { %p243_p10 = pnand %p241_p9, %p238_p8 }
  0x17   :  { %246 = shalt.err (!%p243_p10)
}
  0x18   :  { %s247_s6 = scalar_lea.vmem %s36_s15, 256  ;;  %p252_p12 = scmp.lt.s32.totalorder %s36_s15, %s36_s15 }
  0x19   :  { %p248_p11 = scmp.ne.s32.totalorder %s36_s15, %s247_s6  ;;  %p253_p13 = scmp.lt.s32.totalorder %s247_s6, %s247_s6 }
  0x1b   :  { %p254_p0 = por %p253_p13, %p252_p12 }
  0x1d   :  { %p255_p1 = pnand %p254_p0, %p248_p11 }
  0x1f   :  { %258 = shalt.err (!%p255_p1)
}
  0x20   :  { %38 = dma.hbm_to_vmem [thread:$0]  %s340_s1, 256, %s36_s15, [#allocation7]  }
  0x21   :  { %259 = dma.done.wait [#allocation5], 256  }
  0x22   :  { %260 = vsyncadd [#allocation5], 4294967040 }
  0x23   :  { %261 = dma.done.wait [#allocation7], 256  }
  0x24   :  { %262 = vsyncadd [#allocation7], 4294967040  ;;  %v69_v0 = vlaneseq  ;;  %vm53_vm0 = vcmask 1024   ;;  %v265_v1 = vmov 1983009808   ;;  %v266_v4 = vmov 0.0  }
  0x25   :  { %v67_v2 = vunpack.c.l.s4 %v265_v1  ;;  %54 = vst.msk [vmem:[#allocation2] sm:$0x3] %vm53_vm0, %v266_v4  ;;  %55 = vst.msk [vmem:[#allocation3] sm:$0x3] %vm53_vm0, %v266_v4  ;;  %v56_v7 = vld [vmem:[#allocation4] sm:$0xff]  ;;  %v57_v8 = vld [vmem:[#allocation4 + $0x8] sm:$0xff] }
  0x26   :  { %v70_v3 = vshrl.u32 %v69_v0, 7  ;;  %v58_v9 = vld [vmem:[#allocation6] sm:$0xff]  ;;  %v59_v10 = vld [vmem:[#allocation6 + $0x8] sm:$0xff]  ;;  %vm107_vm1 = vcmask 1041408  }
  0x27   :  { %v68_v5 = vunpack.c.0.s8 %v67_v2  ;;  %v61_v11 = vmul.f32 %v58_v9, %v56_v7  ;;  %v129_v12 = vadd.f32 %v58_v9, %v56_v7  ;;  %v62_v13 = vmul.f32 %v59_v10, %v57_v8 }
  0x28   :  { %v130_v20 = vadd.f32 %v59_v10, %v57_v8 }
  0x29   :  { %v71_v6 = vsub.s32 %v68_v5, %v70_v3  ;;  %v65_v14 = vcombine.high %v61_v11, %v61_v11  ;;  %v133_v16 = vcombine.high %v129_v12, %v129_v12  ;;  %v82_v18 = vcombine.high %v62_v13, %v62_v13 }
  0x2a   :  { %v150_v31 = vcombine.high %v130_v20, %v130_v20 }
  0x2b   :  { %v72_v15 = vrot.slane %v61_v11, %v71_v6  ;;  %v140_v17 = vrot.slane %v129_v12, %v71_v6  ;;  %v89_v19 = vrot.slane %v62_v13, %v71_v6  ;;  %v79_v21 = vrot.slane %v65_v14, %v71_v6 }
  0x2c   :  { %v147_v24 = vrot.slane %v133_v16, %v71_v6  ;;  %v157_v32 = vrot.slane %v130_v20, %v71_v6  ;;  %v96_v33 = vrot.slane %v82_v18, %v71_v6  ;;  %v164_v43 = vrot.slane %v150_v31, %v71_v6  ;;  %v60_v1 = vld [vmem:[#allocation2] sm:$0x3]  ;;  %v128_v4 = vld [vmem:[#allocation3] sm:$0x3] }
  0x2d   :  { %v80_v22 = vcombine.high %v72_v15, %v72_v15  ;;  %v108_v23 = vsel %vm107_vm1, %v72_v15, 0.0  ;;  %v148_v25 = vcombine.high %v140_v17, %v140_v17  ;;  %v81_v26 = vcombine.high %v79_v21, %v79_v21 }
  0x2e   :  { %v111_v28 = vsel %vm107_vm1, %v79_v21, 0.0  ;;  %v149_v30 = vcombine.high %v147_v24, %v147_v24  ;;  %v97_v34 = vcombine.high %v89_v19, %v89_v19  ;;  %v175_v36 = vsel %vm107_vm1, %v140_v17, 0.0 }
  0x2f   :  { %v109_v27 = vsel %vm107_vm1, %v80_v22, 0.0  ;;  %v113_v35 = vsel %vm107_vm1, %v81_v26, 0.0  ;;  %v176_v38 = vsel %vm107_vm1, %v148_v25, 0.0  ;;  %v178_v39 = vsel %vm107_vm1, %v147_v24, 0.0 }
  0x30   :  { %v110_v29 = vadd.f32 %v109_v27, %v108_v23  ;;  %v115_v40 = vsel %vm107_vm1, %v89_v19, 0.0  ;;  %v177_v41 = vadd.f32 %v176_v38, %v175_v36  ;;  %v165_v44 = vcombine.high %v157_v32, %v157_v32 }
  0x31   :  { %v180_v45 = vsel %vm107_vm1, %v149_v30, 0.0  ;;  %v98_v46 = vcombine.high %v96_v33, %v96_v33  ;;  %v117_v47 = vsel %vm107_vm1, %v97_v34, 0.0  ;;  %v182_v50 = vsel %vm107_vm1, %v157_v32, 0.0 }
  0x32   :  { %v112_v37 = vadd.f32 %v111_v28, %v110_v29  ;;  %v179_v48 = vadd.f32 %v178_v39, %v177_v41  ;;  %v119_v51 = vsel %vm107_vm1, %v96_v33, 0.0  ;;  %v166_v54 = vcombine.high %v164_v43, %v164_v43 }
  0x33   :  { %v184_v55 = vsel %vm107_vm1, %v165_v44, 0.0  ;;  %v121_v56 = vsel %vm107_vm1, %v98_v46, 0.0  ;;  %v186_v59 = vsel %vm107_vm1, %v164_v43, 0.0 }
  0x34   :  { %v114_v42 = vadd.f32 %v113_v35, %v112_v37  ;;  %v181_v52 = vadd.f32 %v180_v45, %v179_v48  ;;  %v188_v62 = vsel %vm107_vm1, %v166_v54, 0.0 }
  0x36   :  { %v116_v49 = vadd.f32 %v115_v40, %v114_v42  ;;  %v183_v57 = vadd.f32 %v182_v50, %v181_v52 }
  0x38   :  { %v118_v53 = vadd.f32 %v117_v47, %v116_v49  ;;  %v185_v60 = vadd.f32 %v184_v55, %v183_v57 }
  0x3a   :  { %v120_v58 = vadd.f32 %v119_v51, %v118_v53  ;;  %v187_v63 = vadd.f32 %v186_v59, %v185_v60 }
  0x3c   :  { %v122_v61 = vadd.f32 %v121_v56, %v120_v58  ;;  %v189_v0 = vadd.f32 %v188_v62, %v187_v63 }
  0x3e   :  { %123 = vadd.xlane.f32.xlu0 %v122_v61 }
  0x42   :  { %190 = vadd.xlane.f32.xlu0 %v189_v0 }
  0xcb   :  { %v124_v2 = vpop.xlane.xlu0 %123 }
  0xcc   :  { %v125_v3 = vadd.f32 %v124_v2, %v60_v1 }
  0xce   :  { %127 = vst.msk [vmem:[#allocation2] sm:$0x3] %vm53_vm0, %v125_v3 }
  0xcf   :  { %v191_v5 = vpop.xlane.xlu0 %190 }
  0xd0   :  { %v192_v6 = vadd.f32 %v191_v5, %v128_v4 }
  0xd2   :  { %193 = vst.msk [vmem:[#allocation3] sm:$0x3] %vm53_vm0, %v192_v6 }
  0xd5   :  { %v197_v7 = vld [vmem:[#allocation2] sm:$0x3] }
  0xd6   :  { %198 = vst.msk [vmem:[%s341_s2] sm:$0x3] %vm53_vm0, %v197_v7 }
  0xd9   :  { %v199_v8 = vld [vmem:[#allocation3] sm:$0x3] }
  0xda   :  { %200 = vst.msk [vmem:[%s342_s3] sm:$0x3] %vm53_vm0, %v199_v8 }
  0xdb   :  { %209 = vsyncpa [#allocation5], 1 }
  0xdc   :  { %210 = vsyncpa [#allocation7], 1 }

</bundles_post_ra>
